<compile_context>
chip_gen: v6e
topology: v6e:2x2x1
jax: 0.10.0
libtpu: 0.0.40
codegen_flags: <defaults>
</compile_context>

<pallas_src>
import functools

import jax
import jax.numpy as jnp
from jax import lax
from jax.experimental import pallas as pl
from jax.experimental.pallas import tpu as pltpu


def _round_up(x, m):
    return ((x + m - 1) // m) * m


def _pred_class(p, cls_iota, c_dim):
    """First-occurrence argmax over the class (sublane) axis.

    p: (C, w) float.  Two XLU sublane reductions + one dense (C, w) compare/select on
    the VPU; min-index among equal maxima keeps torch.argmax first-occurrence ties.
    """
    if c_dim == 1:
        return jnp.zeros((1, p.shape[1]), jnp.int32)
    mx = jnp.max(p, axis=0, keepdims=True)                    # XLU reduce
    cand = jnp.where(p == mx, cls_iota, c_dim)                # full-density VPU
    return jnp.min(cand, axis=0, keepdims=True)               # XLU reduce (first max)


def _hist_kernel(preds_ref, tgt_ref, acc_ref, *, n, hw, tile_hw, chunk, n_half,
                 binary, unroll):
    """Small-n path: pure-VPU per-batch histogram with an in-vreg accumulator.

    preds_ref: (C, tile_hw)  float  logits, pixels on lanes (NCHW-native)
    tgt_ref:   (1, tile_hw)  int    labels (narrow dtype), pixels on lanes
    acc_ref:   (nn_pad, chunk) int32 per-(batch, split) partial histogram, revisited
               across the pixel-tile grid axis and written once per grid step.
    """
    h = pl.program_id(1)
    j = pl.program_id(2)
    c_dim = preds_ref.shape[0]
    nn_pad = acc_ref.shape[0]
    # Unclamped tile index -> pixel base.  The DMA index_map clamps to the last real
    # tile, so duplicated / past-the-end pixels are dropped by the px < hw mask.
    base = (h * n_half + j) * tile_hw

    n_full = tile_hw // chunk
    rem = tile_hw - n_full * chunk
    if n_full == 1 and rem == 0:            # single static chunk (chunk == tile_hw)
        n_full, rem = 0, tile_hw

    def contrib(p, a, off, bins_w, cls_w, px_w):
        a = a.astype(jnp.int32)             # widen narrow label dtype in-kernel
        if binary:
            b = (p > 0).astype(jnp.int32)   # (1, w)
        else:
            b = _pred_class(p, cls_w, c_dim)
        px = off + px_w
        valid = (a >= 0) & (a < n) & (px < hw)
        inds = jnp.where(valid, n * a + b, -1)                 # -1 => dropped
        return (bins_w == inds).astype(jnp.int32)              # (nn_pad, w) exact counts

    local = jnp.zeros((nn_pad, chunk), jnp.int32)
    if n_full > 0:
        # Hoisted loop-invariant iotas.
        bins = lax.broadcasted_iota(jnp.int32, (nn_pad, chunk), 0)
        px_i = lax.broadcasted_iota(jnp.int32, (1, chunk), 1)
        cls_i = None if binary else lax.broadcasted_iota(jnp.int32, (c_dim, chunk), 0)

        def body(g, acc):
            lo = pl.multiple_of(g * chunk, 128)                # chunk % 128 == 0 here
            p = preds_ref[:, pl.ds(lo, chunk)]
            a = tgt_ref[:, pl.ds(lo, chunk)]
            return acc + contrib(p, a, base + lo, bins, cls_i, px_i)

        local = lax.fori_loop(0, n_full, body, local, unroll=unroll)

    # Static ragged-tail chunk (once per grid step; width rem < chunk, or the whole
    # tile in the single-static-chunk case).
    epi = None
    if rem > 0:
        lo = n_full * chunk
        p = preds_ref[:, lo:lo + rem]
        a = tgt_ref[:, lo:lo + rem]
        bins_r = lax.broadcasted_iota(jnp.int32, (nn_pad, rem), 0)
        px_r = lax.broadcasted_iota(jnp.int32, (1, rem), 1)
        cls_r = None if binary else lax.broadcasted_iota(jnp.int32, (c_dim, rem), 0)
        epi = contrib(p, a, base + lo, bins_r, cls_r, px_r)
        if rem == chunk:
            local = local + epi
            epi = None

    @pl.when(j == 0)
    def _():
        acc_ref[...] = local

    @pl.when(j != 0)
    def _():
        acc_ref[...] += local

    if epi is not None:
        acc_ref[:, :rem] += epi


def _confmat_kernel(preds_ref, tgt_ref, acc_ref, *, n, hw, tile_hw, chunk, n_half,
                    unroll):
    """General path: shrunken (n_pad, w) one-hots contracted over pixels on the MXU.

    acc_ref: (n_pad, n_pad) float32 per-(batch, split) confusion-matrix accumulator
             (exact up to 2^24 counts per cell per image).
    """
    h = pl.program_id(1)
    j = pl.program_id(2)
    c_dim = preds_ref.shape[0]
    n_pad = acc_ref.shape[0]
    base = (h * n_half + j) * tile_hw

    n_full = tile_hw // chunk
    rem = tile_hw - n_full * chunk
    if n_full == 1 and rem == 0:
        n_full, rem = 0, tile_hw

    def contrib(p, a, off, cls_c_w, cls_n_w, px_w):
        a = a.astype(jnp.int32)
        b = _pred_class(p, cls_c_w, c_dim)                     # (1, w)
        px = off + px_w
        valid = (a >= 0) & (a < n) & (px < hw)
        oh_a = ((cls_n_w == a) & valid).astype(jnp.bfloat16)   # (n_pad, w) target one-hot
        oh_b = (cls_n_w == b).astype(jnp.bfloat16)             # (n_pad, w) pred one-hot
        # (M,K) x (N,K) -> (M,N) contraction over the pixel (lane) axis on the MXU.
        return lax.dot_general(oh_a, oh_b, (((1,), (1,)), ((), ())),
                               preferred_element_type=jnp.float32)

    local = jnp.zeros((n_pad, n_pad), jnp.float32)
    if n_full > 0:
        cls_c = lax.broadcasted_iota(jnp.int32, (c_dim, chunk), 0)
        cls_n = lax.broadcasted_iota(jnp.int32, (n_pad, chunk), 0)
        px_i = lax.broadcasted_iota(jnp.int32, (1, chunk), 1)

        def body(g, acc):
            lo = pl.multiple_of(g * chunk, 128)
            p = preds_ref[:, pl.ds(lo, chunk)]
            a = tgt_ref[:, pl.ds(lo, chunk)]
            return acc + contrib(p, a, base + lo, cls_c, cls_n, px_i)

        local = lax.fori_loop(0, n_full, body, local, unroll=unroll)

    if rem > 0:
        lo = n_full * chunk
        p = preds_ref[:, lo:lo + rem]
        a = tgt_ref[:, lo:lo + rem]
        cls_c_r = lax.broadcasted_iota(jnp.int32, (c_dim, rem), 0)
        cls_n_r = lax.broadcasted_iota(jnp.int32, (n_pad, rem), 0)
        px_r = lax.broadcasted_iota(jnp.int32, (1, rem), 1)
        local = local + contrib(p, a, base + lo, cls_c_r, cls_n_r, px_r)

    @pl.when(j == 0)
    def _():
        acc_ref[...] = local

    @pl.when(j != 0)
    def _():
        acc_ref[...] += local


def iou_forward(preds, targets, num_classes, *, max_tile_hw=8192):
    """Forward pass of torchkeras IOU: returns (mean_iou, confusion_matrix float32)."""
    n = num_classes if num_classes >= 2 else 2
    if n > 128:
        raise NotImplementedError("IOU Pallas kernel supports at most 128 classes")

    preds = jnp.asarray(preds)
    targets = jnp.asarray(targets)
    binary = num_classes < 2

    nb = targets.shape[0]
    hw = 1
    for d in targets.shape[1:]:
        hw *= d

    # NCHW-native: reshapes only (free, no HBM transpose / stack).
    if binary:
        c_dim = 1
        p3 = preds.reshape(nb, 1, hw)
    else:
        c_dim = preds.shape[1]
        p3 = preds.reshape(nb, c_dim, hw)
    # Keep labels in their narrow storage dtype through the DMA; widen in-kernel.
    if targets.dtype.name not in ("int8", "uint8", "int32", "uint32"):
        targets = targets.astype(jnp.int32)
    t3 = targets.reshape(nb, 1, hw)

    if nb == 0 or hw == 0:
        mat = jnp.zeros((n, n), jnp.float32)
    else:
        tile_hw = hw if hw <= max_tile_hw else max_tile_hw     # mult of 128 or full dim
        n_tiles = pl.cdiv(hw, tile_hw)
        n_split = 2 if n_tiles >= 2 else 1                     # v7x: both TCs even at nb=1
        n_half = pl.cdiv(n_tiles, n_split)
        last_tile = n_tiles - 1
        grid = (nb, n_split, n_half)

        def pix_map(b, h, j):
            # Clamp keeps the DMA in bounds; the kernel masks duplicated tiles via px<hw.
            return (b, 0, jnp.minimum(h * n_half + j, last_tile))

        in_specs = [
            pl.BlockSpec((None, c_dim, tile_hw), pix_map),     # (C, tile_hw) lane-dense
            pl.BlockSpec((None, 1, tile_hw), pix_map),         # (1, tile_hw) lane-dense
        ]
        cparams = pltpu.CompilerParams(
            dimension_semantics=("parallel", "parallel", "arbitrary"))

        if n * n <= 32:
            # VPU histogram fast path (binary / very few classes).
            nn_pad = _round_up(n * n, 8)
            desired = min(512, max(128, (8192 // nn_pad) // 128 * 128))
            chunk = min(desired, tile_hw)
            part = pl.pallas_call(
                functools.partial(_hist_kernel, n=n, hw=hw, tile_hw=tile_hw,
                                  chunk=chunk, n_half=n_half, binary=binary, unroll=2),
                out_shape=jax.ShapeDtypeStruct((nb, n_split, nn_pad, chunk), jnp.int32),
                grid_spec=pltpu.PrefetchScalarGridSpec(
                    num_scalar_prefetch=0, grid=grid, in_specs=in_specs,
                    out_specs=pl.BlockSpec((None, None, nn_pad, chunk),
                                           lambda b, h, j: (b, h, 0, 0))),
                compiler_params=cparams,
            )(p3, t3)
            counts = part.sum(axis=(0, 1, 3))[: n * n]          # tiny glue
            mat = counts.reshape(n, n).astype(jnp.float32)
        else:
            # MXU confusion-matrix path with shrunken (n_pad, w) one-hots.
            n_pad = _round_up(n, 8)
            desired = min(1024, max(128, (16384 // max(c_dim, n_pad)) // 128 * 128))
            chunk = min(desired, tile_hw)
            unroll = 2 if max(c_dim, n_pad) <= 32 else 1
            part = pl.pallas_call(
                functools.partial(_confmat_kernel, n=n, hw=hw, tile_hw=tile_hw,
                                  chunk=chunk, n_half=n_half, unroll=unroll),
                out_shape=jax.ShapeDtypeStruct((nb, n_split, n_pad, n_pad), jnp.float32),
                grid_spec=pltpu.PrefetchScalarGridSpec(
                    num_scalar_prefetch=0, grid=grid, in_specs=in_specs,
                    out_specs=pl.BlockSpec((None, None, n_pad, n_pad),
                                           lambda b, h, j: (b, h, 0, 0))),
                compiler_params=cparams,
            )(p3, t3)
            mat = part.sum(axis=(0, 1))[:n, :n]

    # eval_iou on the tiny (n, n) matrix is scalar-sized glue -> plain JAX.
    diag = jnp.diagonal(mat)
    iou = diag / (mat.sum(axis=1) + mat.sum(axis=0) - diag)
    return iou.mean(), mat


def _iou_reference(preds, targets, num_classes):
    """Pure-JAX reference mirroring the PyTorch forward, for correctness checks."""
    n = num_classes if num_classes >= 2 else 2
    a = targets.reshape(-1).astype(jnp.int32)
    if num_classes >= 2:
        b = jnp.argmax(preds, axis=1).reshape(-1).astype(jnp.int32)
    else:
        b = (preds.reshape(-1) > 0).astype(jnp.int32)
    k = (a >= 0) & (a < n)
    inds = jnp.where(k, n * a + b, n * n)                 # invalid -> overflow bin
    counts = jnp.bincount(inds, length=n * n + 1)[: n * n]
    mat = counts.reshape(n, n).astype(jnp.float32)
    diag = jnp.diagonal(mat)
    iou = diag / (mat.sum(1) + mat.sum(0) - diag)
    return iou.mean(), mat


def _check(name, preds, targets, num_classes, **kw):
    mean_iou, mat = iou_forward(preds, targets, num_classes, **kw)
    mean_iou = jax.block_until_ready(mean_iou)
    ref_iou, ref_mat = _iou_reference(preds, targets, num_classes)
    assert jnp.allclose(mat, ref_mat), (name, mat, ref_mat)
    assert jnp.allclose(mean_iou, ref_iou, atol=1e-6, equal_nan=True), (name, mean_iou, ref_iou)
    return mean_iou, mat


if __name__ == "__main__":
    key = jax.random.PRNGKey(0)
    k1, k2, k3, k4, k5, k6, k7, k8 = jax.random.split(key, 8)
    N = 2

    # 1) Multiclass n=4 (VPU histogram path): default run exercises the fori_loop
    #    chunking; the small max_tile_hw reruns exercise the 2-way pixel split and
    #    the clamped / ragged pixel tiles.
    C, H, W = 4, 32, 32
    preds = jax.random.normal(k1, (N, C, H, W), dtype=jnp.float32)
    targets = jax.random.randint(k2, (N, H, W), 0, C, dtype=jnp.int32)
    running_mat = jnp.zeros((C, C), dtype=jnp.int32)       # nn.Parameter `self.mat` analogue
    mean_iou, mati = _check("hist_n4", preds, targets, num_classes=C)
    running_mat = running_mat + mati.astype(jnp.int32)     # self.mat += mati
    _check("hist_n4_split", preds, targets, num_classes=C, max_tile_hw=256)
    _check("hist_n4_ragged_split", preds, targets, num_classes=C, max_tile_hw=384)

    # 2) Binary (num_classes < 2): uint8 targets stay narrow through the DMA.
    preds_b = jax.random.normal(k3, (N, 16, 16), dtype=jnp.float32)
    targets_b = jax.random.randint(k4, (N, 16, 16), 0, 2, dtype=jnp.int32).astype(jnp.uint8)
    _check("binary", preds_b, targets_b, num_classes=1)

    # 3) n=16 (MXU confusion-matrix path, n_pad=16 one-hots): fori_loop + aligned tail.
    C16, H3, W3 = 16, 48, 48
    preds16 = jax.random.normal(k5, (N, C16, H3, W3), dtype=jnp.float32)
    targets16 = jax.random.randint(k6, (N, H3, W3), 0, C16, dtype=jnp.int32)
    _check("confmat_n16", preds16, targets16, num_classes=C16)

    # 4) n=7 with odd spatial size (hw=169): confusion-matrix path, unaligned static
    #    tail chunk (odd contraction length on the MXU).
    C7, H4, W4 = 7, 13, 13
    preds7 = jax.random.normal(k7, (N, C7, H4, W4), dtype=jnp.float32)
    targets7 = jax.random.randint(k8, (N, H4, W4), 0, C7, dtype=jnp.int32)
    _check("confmat_n7_ragged", preds7, targets7, num_classes=C7)

    print("KERNEL_OK")
</pallas_src>

<mosaic_0001>
module attributes {stable_mosaic.version = 11 : i64} {
  func.func @_hist_kernel(%arg0: i32, %arg1: i32, %arg2: i32, %arg3: memref<1x4x1024xf32, #tpu.memory_space<vmem>>, %arg4: memref<1x1x1024xi32, #tpu.memory_space<vmem>>, %arg5: memref<1x1x16x512xi32, #tpu.memory_space<vmem>>) attributes {dimension_semantics = [#tpu.dimension_semantics<parallel>, #tpu.dimension_semantics<parallel>, #tpu.dimension_semantics<arbitrary>], iteration_bounds = array<i64: 2, 1, 1>, scalar_prefetch = 0 : i64, scratch_operands = 0 : i64, tpu.core_type = #tpu.core_type<tc>, window_params = [{transform_indices = @transform_0, window_bounds = array<i64: 1, 4, 1024>}, {transform_indices = @transform_1, window_bounds = array<i64: 1, 1, 1024>}, {transform_indices = @transform_2, window_bounds = array<i64: 1, 1, 16, 512>}]} {
    %c1_i32 = arith.constant 1 : i32
    %0 = arith.muli %arg1, %c1_i32 : i32
    %1 = arith.addi %0, %arg2 : i32
    %c1024_i32 = arith.constant 1024 : i32
    %2 = arith.muli %1, %c1024_i32 : i32
    %c0_i32 = arith.constant 0 : i32
    %3 = vector.broadcast %c0_i32 : i32 to vector<16x512xi32>
    %4 = tpu.iota {dimensions = array<i32: 0>} : vector<16x512xi32>
    %5 = tpu.iota {dimensions = array<i32: 1>} : vector<1x512xi32>
    %6 = tpu.iota {dimensions = array<i32: 0>} : vector<4x512xi32>
    %c0_i32_0 = arith.constant 0 : i32
    %c512_i32 = arith.constant 512 : i32
    %7 = arith.muli %c0_i32_0, %c512_i32 : i32
    %8 = tpu.assume_multiple %7, 128 : i32
    %c0 = arith.constant 0 : index
    %c0_1 = arith.constant 0 : index
    %9 = arith.index_cast %8 : i32 to index
    %10 = vector.load %arg3[%c0, %c0_1, %9] : memref<1x4x1024xf32, #tpu.memory_space<vmem>>, vector<1x4x512xf32>
    %11 = vector.shape_cast %10 : vector<1x4x512xf32> to vector<4x512xf32>
    %c0_2 = arith.constant 0 : index
    %c0_3 = arith.constant 0 : index
    %12 = arith.index_cast %8 : i32 to index
    %13 = vector.load %arg4[%c0_2, %c0_3, %12] : memref<1x1x1024xi32, #tpu.memory_space<vmem>>, vector<1x1x512xi32>
    %14 = vector.shape_cast %13 : vector<1x1x512xi32> to vector<1x512xi32>
    %15 = arith.addi %2, %8 : i32
    %cst = arith.constant dense<0xFF800000> : vector<512xf32>
    %16 = vector.multi_reduction <maximumf>, %11, %cst [0] : vector<4x512xf32> to vector<512xf32>
    %17 = vector.shape_cast %16 : vector<512xf32> to vector<1x512xf32>
    %18 = vector.broadcast %17 : vector<1x512xf32> to vector<4x512xf32>
    %19 = arith.cmpf oeq, %11, %18 : vector<4x512xf32>
    %c4_i32 = arith.constant 4 : i32
    %20 = vector.broadcast %c4_i32 : i32 to vector<4x512xi32>
    %21 = arith.select %19, %6, %20 : vector<4x512xi1>, vector<4x512xi32>
    %cst_4 = arith.constant dense<2147483647> : vector<512xi32>
    %22 = vector.multi_reduction <minsi>, %21, %cst_4 [0] : vector<4x512xi32> to vector<512xi32>
    %23 = vector.shape_cast %22 : vector<512xi32> to vector<1x512xi32>
    %24 = vector.broadcast %15 : i32 to vector<1x512xi32>
    %25 = arith.addi %24, %5 : vector<1x512xi32>
    %c0_i32_5 = arith.constant 0 : i32
    %26 = vector.broadcast %c0_i32_5 : i32 to vector<1x512xi32>
    %27 = arith.cmpi sge, %14, %26 : vector<1x512xi32>
    %c4_i32_6 = arith.constant 4 : i32
    %28 = vector.broadcast %c4_i32_6 : i32 to vector<1x512xi32>
    %29 = arith.cmpi slt, %14, %28 : vector<1x512xi32>
    %30 = arith.andi %27, %29 : vector<1x512xi1>
    %c1024_i32_7 = arith.constant 1024 : i32
    %31 = vector.broadcast %c1024_i32_7 : i32 to vector<1x512xi32>
    %32 = arith.cmpi slt, %25, %31 : vector<1x512xi32>
    %33 = arith.andi %30, %32 : vector<1x512xi1>
    %c4_i32_8 = arith.constant 4 : i32
    %34 = vector.broadcast %c4_i32_8 : i32 to vector<1x512xi32>
    %35 = arith.muli %34, %14 : vector<1x512xi32>
    %36 = arith.addi %35, %23 : vector<1x512xi32>
    %c-1_i32 = arith.constant -1 : i32
    %37 = vector.broadcast %c-1_i32 : i32 to vector<1x512xi32>
    %38 = arith.select %33, %36, %37 : vector<1x512xi1>, vector<1x512xi32>
    %39 = vector.broadcast %38 : vector<1x512xi32> to vector<16x512xi32>
    %40 = arith.cmpi eq, %4, %39 : vector<16x512xi32>
    %41 = arith.extui %40 : vector<16x512xi1> to vector<16x512xi32>
    %42 = arith.addi %3, %41 : vector<16x512xi32>
    %c1_i32_9 = arith.constant 1 : i32
    %c512_i32_10 = arith.constant 512 : i32
    %43 = arith.muli %c1_i32_9, %c512_i32_10 : i32
    %44 = tpu.assume_multiple %43, 128 : i32
    %c0_11 = arith.constant 0 : index
    %c0_12 = arith.constant 0 : index
    %45 = arith.index_cast %44 : i32 to index
    %46 = vector.load %arg3[%c0_11, %c0_12, %45] : memref<1x4x1024xf32, #tpu.memory_space<vmem>>, vector<1x4x512xf32>
    %47 = vector.shape_cast %46 : vector<1x4x512xf32> to vector<4x512xf32>
    %c0_13 = arith.constant 0 : index
    %c0_14 = arith.constant 0 : index
    %48 = arith.index_cast %44 : i32 to index
    %49 = vector.load %arg4[%c0_13, %c0_14, %48] : memref<1x1x1024xi32, #tpu.memory_space<vmem>>, vector<1x1x512xi32>
    %50 = vector.shape_cast %49 : vector<1x1x512xi32> to vector<1x512xi32>
    %51 = arith.addi %2, %44 : i32
    %cst_15 = arith.constant dense<0xFF800000> : vector<512xf32>
    %52 = vector.multi_reduction <maximumf>, %47, %cst_15 [0] : vector<4x512xf32> to vector<512xf32>
    %53 = vector.shape_cast %52 : vector<512xf32> to vector<1x512xf32>
    %54 = vector.broadcast %53 : vector<1x512xf32> to vector<4x512xf32>
    %55 = arith.cmpf oeq, %47, %54 : vector<4x512xf32>
    %c4_i32_16 = arith.constant 4 : i32
    %56 = vector.broadcast %c4_i32_16 : i32 to vector<4x512xi32>
    %57 = arith.select %55, %6, %56 : vector<4x512xi1>, vector<4x512xi32>
    %cst_17 = arith.constant dense<2147483647> : vector<512xi32>
    %58 = vector.multi_reduction <minsi>, %57, %cst_17 [0] : vector<4x512xi32> to vector<512xi32>
    %59 = vector.shape_cast %58 : vector<512xi32> to vector<1x512xi32>
    %60 = vector.broadcast %51 : i32 to vector<1x512xi32>
    %61 = arith.addi %60, %5 : vector<1x512xi32>
    %c0_i32_18 = arith.constant 0 : i32
    %62 = vector.broadcast %c0_i32_18 : i32 to vector<1x512xi32>
    %63 = arith.cmpi sge, %50, %62 : vector<1x512xi32>
    %c4_i32_19 = arith.constant 4 : i32
    %64 = vector.broadcast %c4_i32_19 : i32 to vector<1x512xi32>
    %65 = arith.cmpi slt, %50, %64 : vector<1x512xi32>
    %66 = arith.andi %63, %65 : vector<1x512xi1>
    %c1024_i32_20 = arith.constant 1024 : i32
    %67 = vector.broadcast %c1024_i32_20 : i32 to vector<1x512xi32>
    %68 = arith.cmpi slt, %61, %67 : vector<1x512xi32>
    %69 = arith.andi %66, %68 : vector<1x512xi1>
    %c4_i32_21 = arith.constant 4 : i32
    %70 = vector.broadcast %c4_i32_21 : i32 to vector<1x512xi32>
    %71 = arith.muli %70, %50 : vector<1x512xi32>
    %72 = arith.addi %71, %59 : vector<1x512xi32>
    %c-1_i32_22 = arith.constant -1 : i32
    %73 = vector.broadcast %c-1_i32_22 : i32 to vector<1x512xi32>
    %74 = arith.select %69, %72, %73 : vector<1x512xi1>, vector<1x512xi32>
    %75 = vector.broadcast %74 : vector<1x512xi32> to vector<16x512xi32>
    %76 = arith.cmpi eq, %4, %75 : vector<16x512xi32>
    %77 = arith.extui %76 : vector<16x512xi1> to vector<16x512xi32>
    %78 = arith.addi %42, %77 : vector<16x512xi32>
    %c2_i32 = arith.constant 2 : i32
    %c0_i32_23 = arith.constant 0 : i32
    %79 = arith.cmpi eq, %arg2, %c0_i32_23 : i32
    %80 = arith.extui %79 : i1 to i32
    %c0_i32_24 = arith.constant 0 : i32
    %81 = arith.cmpi ne, %80, %c0_i32_24 : i32
    scf.if %81 {
      %c0_27 = arith.constant 0 : index
      %c0_28 = arith.constant 0 : index
      %c0_29 = arith.constant 0 : index
      %c0_30 = arith.constant 0 : index
      %85 = vector.load %arg5[%c0_27, %c0_28, %c0_29, %c0_30] : memref<1x1x16x512xi32, #tpu.memory_space<vmem>>, vector<1x1x16x512xi32>
      %86 = vector.shape_cast %85 : vector<1x1x16x512xi32> to vector<16x512xi32>
      %87 = vector.shape_cast %78 : vector<16x512xi32> to vector<1x1x16x512xi32>
      tpu.vector_store %arg5[%c0_27, %c0_28, %c0_29, %c0_30], %87 {strides = array<i32>} : memref<1x1x16x512xi32, #tpu.memory_space<vmem>>, vector<1x1x16x512xi32>,
    } else {
    }
    %c0_i32_25 = arith.constant 0 : i32
    %82 = arith.cmpi ne, %arg2, %c0_i32_25 : i32
    %83 = arith.extui %82 : i1 to i32
    %c0_i32_26 = arith.constant 0 : i32
    %84 = arith.cmpi ne, %83, %c0_i32_26 : i32
    scf.if %84 {
      %c0_27 = arith.constant 0 : index
      %c0_28 = arith.constant 0 : index
      %c0_29 = arith.constant 0 : index
      %c0_30 = arith.constant 0 : index
      %85 = vector.load %arg5[%c0_27, %c0_28, %c0_29, %c0_30] : memref<1x1x16x512xi32, #tpu.memory_space<vmem>>, vector<1x1x16x512xi32>
      %86 = vector.shape_cast %85 : vector<1x1x16x512xi32> to vector<16x512xi32>
      %87 = arith.addi %86, %78 : vector<16x512xi32>
      %c0_31 = arith.constant 0 : index
      %c0_32 = arith.constant 0 : index
      %c0_33 = arith.constant 0 : index
      %c0_34 = arith.constant 0 : index
      %88 = vector.load %arg5[%c0_31, %c0_32, %c0_33, %c0_34] : memref<1x1x16x512xi32, #tpu.memory_space<vmem>>, vector<1x1x16x512xi32>
      %89 = vector.shape_cast %88 : vector<1x1x16x512xi32> to vector<16x512xi32>
      %90 = vector.shape_cast %87 : vector<16x512xi32> to vector<1x1x16x512xi32>
      tpu.vector_store %arg5[%c0_31, %c0_32, %c0_33, %c0_34], %90 {strides = array<i32>} : memref<1x1x16x512xi32, #tpu.memory_space<vmem>>, vector<1x1x16x512xi32>,
    } else {
    }
    return
  }
  func.func @transform_0(%arg0: i32, %arg1: i32, %arg2: i32) -> (i32, i32, i32) {
    %c1_i32 = arith.constant 1 : i32
    %0 = arith.muli %arg1, %c1_i32 : i32
    %1 = arith.addi %0, %arg2 : i32
    %c0_i32 = arith.constant 0 : i32
    %2 = arith.minsi %1, %c0_i32 : i32
    %c0_i32_0 = arith.constant 0 : i32
    %c0_i32_1 = arith.constant 0 : i32
    return %arg0, %c0_i32_0, %2 : i32, i32, i32
  }
  func.func @transform_1(%arg0: i32, %arg1: i32, %arg2: i32) -> (i32, i32, i32) {
    %c1_i32 = arith.constant 1 : i32
    %0 = arith.muli %arg1, %c1_i32 : i32
    %1 = arith.addi %0, %arg2 : i32
    %c0_i32 = arith.constant 0 : i32
    %2 = arith.minsi %1, %c0_i32 : i32
    %c0_i32_0 = arith.constant 0 : i32
    %c0_i32_1 = arith.constant 0 : i32
    return %arg0, %c0_i32_0, %2 : i32, i32, i32
  }
  func.func @transform_2(%arg0: i32, %arg1: i32, %arg2: i32) -> (i32, i32, i32, i32) {
    %c0_i32 = arith.constant 0 : i32
    %c0_i32_0 = arith.constant 0 : i32
    %c0_i32_1 = arith.constant 0 : i32
    return %arg0, %arg1, %c0_i32, %c0_i32_0 : i32, i32, i32, i32
  }
}

</mosaic_0001>

<bundles_post_ra>
// kernel: tpu_custom_call.1
= control target key start
LH: loop header
LB: loop body
LE: loop exit
PB: predicated region body
PF: predicated region fallthrough
CT: control target
= control target key end

     0   :  { %7 = vsyncpa [#allocation3], 0  ;;  %s1397_s0 = inlined_call_operand.hbm [shape: f32[2,4,1024], index: 0, kind: input, shape index: {}]   ;;  %s1398_s1 = inlined_call_operand.hbm [shape: s32[2,1,1024], index: 1, kind: input, shape index: {}]   ;;  %s1399_s2 = inlined_call_operand.hbm [shape: s32[2,1,16,512], index: 2, kind: output, shape index: {}]  }
   0x1   :  { %9 = vsyncpa [#allocation3 + $0x1], 0 }
   0x2   :  { %10 = vsyncpa [#allocation6], 0 }
   0x3   :  { %12 = vsyncpa [#allocation6 + $0x1], 0 }
   0x4   :  { %13 = vsyncpa [#allocation4], 0 }
   0x5   :  { %15 = vsyncpa [#allocation4 + $0x1], 0  ;;  %s1107_s9 = smov 0   ;;  %s1109_s10 = smov 0  }
   0x6   :  { %s1111_s11 = smov 0   ;;  %s1113_s12 = smov 0  }
   0x7   :  { %s1115_s13 = smov 0   ;;  %s1117_s14 = smov 0  }
   0x8 LB: > { %s839_s15 = sadd.s32 4294967295, %s1081_s14   ;;  %s840_s16 = sadd.s32 4294967294, %s1081_s14   ;;  %s1081_s14 = sphi %s1117_s14, %s21_s14   ;;  %s1077_s13 = sphi %s1115_s13, %s1411_s13   ;;  %s1073_s12 = sphi %s1113_s12, %s1410_s12   ;;  %s1069_s11 = sphi %s1111_s11, %s1409_s11   ;;  %s1065_s10 = sphi %s1109_s10, %s1408_s10   ;;  %s1061_s9 = sphi %s1107_s9, %s1407_s9  }
   0x9   : > { %s40_s17 = sadd.s32 1, %s1077_s13  ;;  %s55_s18 = sadd.s32 1, %s1069_s11 }
   0xa   : > { %p42_p0 = scmp.ge.s32.totalorder %s40_s17, 2  ;;  %p62_p1 = scmp.ne.s32.totalorder %s1069_s11, %s1065_s10 }
   0xb   : > { %p63_p2 = scmp.eq.s32.totalorder %s1081_s14, 0  ;;  %p68_p3 = scmp.ne.s32.totalorder %s1065_s10, %s1061_s9 }
   0xc   : > { %s1413_s17 = smov (%p42_p0, %s40_s17), 0  ;;  %p69_p5 = scmp.eq.s32.totalorder %s839_s15, 0 }
   0xd   : > { %p1148_p4 = por %p63_p2, %p62_p1  ;;  %s50_s20 = ssub.s32 %s1077_s13, %s1413_s17 }
   0xe   : > { %p128_p6 = scmp.eq.s32.totalorder %s839_s15, 1  ;;  %p53_p7 = scmp.eq.s32.totalorder %s50_s20, 0 }
   0xf   : > { %p1154_p8 = por %p69_p5, %p68_p3  ;;  %p134_p10 = scmp.eq.s32.totalorder %s840_s16, 1 }
  0x10   : > { %p1158_p9 = por %p128_p6, %p62_p1  ;;  %p881_p13 = scmp.lt.s32.totalorder %s1081_s14, 2 }
  0x11   : > { %s1163_s23 = scalar_select %p53_p7, %s1069_s11, %s55_s18  }
  0x12   : > { %p1165_p11 = por %p134_p10, %p68_p3  ;;  %s1172_s25 = sand.u32 1, %s1069_s11  }
  0x13   : > { %s843_s26 = sshll.u32 %s1172_s25, 5  ;;  %s861_s27 = sshll.u32 %s1077_s13, 9 }
  0x14   : > { %s169_s30 = scalar_lea.hbm %s1397_s0, %s861_s27  ;;  %s158_s3 = scalar_lea.vmem [#allocation2], %s843_s26 }
  0x15   : > { %s171_s4 = sshll.u32 %s158_s3, 4  ;;  %p1181_p0 = pnand %p881_p13, %p1148_p4  ;;  %s172_s4 = int_to_ptr.vmem [resolvable:$true] %s171_s4 }
  0x16   : > { %p849_p1 = scmp.ge.s32.totalorder %s1081_s14, 1  ;;  %p200_p2 = scmp.lt.s32.totalorder %s1081_s14, 3 }
  0x17   : > { %s155_s6 = scalar_lea.sflag [#allocation3], %s1172_s25  ;;  %p943_p3 = pneg %p1181_p0 }
  0x18   : > { %s954_s7 = scalar_lea.vmem %s172_s4, 512  ;;  %s1083_s8 = smov [#allocation2]  }
  0x19   : > { %p955_p5 = scmp.ne.s32.totalorder %s172_s4, %s954_s7  ;;  %s959_s15 = sshll.u32 %s1083_s8, 4  ;;  %s960_s15 = int_to_ptr.vmem [resolvable:$false] %s959_s15 }
  0x1a   : > { %s961_s16 = scalar_lea.vmem %s960_s15, 1024  ;;  %p962_p4 = scmp.lt.s32.totalorder %s172_s4, %s960_s15 }
  0x1b   : > { %p957_p6 = pnand %p955_p5, %p943_p3  ;;  %p963_p10 = scmp.lt.s32.totalorder %s961_s16, %s954_s7 }
  0x1d   : > { %p958_p7 = pneg %p957_p6  ;;  %p964_p13 = por %p963_p10, %p962_p4 }
  0x1f   : > { %p965_p12 = pnand %p964_p13, %p958_p7 }
  0x21   : > { %968 = shalt.err (!%p965_p12)
}
  0x22   : > { %873 = dma.hbm_to_vmem [thread:$0]  (!%p1181_p0), %s169_s30, 512, %s172_s4, %s155_s6  }
  0x23   : > { %p1199_p5 = pnand %p849_p1, %p200_p2  ;;  %s846_s19 = sshll.u32 %s1172_s25, 3 }
  0x24   : > { %s862_s20 = sshll.u32 %s1077_s13, 7  ;;  %s182_s29 = scalar_lea.vmem [#allocation5], %s846_s19 }
  0x25   : > { %s193_s28 = scalar_lea.hbm %s1398_s1, %s862_s20  ;;  %s195_s3 = sshll.u32 %s182_s29, 4  ;;  %s196_s3 = int_to_ptr.vmem [resolvable:$true] %s195_s3 }
  0x26   : > { %s179_s7 = scalar_lea.sflag [#allocation6], %s1172_s25  ;;  %s982_s8 = scalar_lea.vmem %s196_s3, 128 }
  0x27   : > { %p983_p12 = scmp.ne.s32.totalorder %s196_s3, %s982_s8  ;;  %s1084_s30 = smov [#allocation5]  }
  0x28   : > { %s987_s4 = sshll.u32 %s1084_s30, 4  ;;  %s988_s4 = int_to_ptr.vmem [resolvable:$false] %s987_s4 }
  0x29   : > { %p985_p6 = pnand %p983_p12, %p943_p3  ;;  %s989_s6 = scalar_lea.vmem %s988_s4, 256 }
  0x2a   : > { %p990_p1 = scmp.lt.s32.totalorder %s196_s3, %s988_s4  ;;  %p991_p2 = scmp.lt.s32.totalorder %s989_s6, %s982_s8 }
  0x2b   : > { %p986_p7 = pneg %p985_p6 }
  0x2c   : > { %p992_p4 = por %p991_p2, %p990_p1 }
  0x2e   : > { %p993_p10 = pnand %p992_p4, %p986_p7 }
  0x30   : > { %996 = shalt.err (!%p993_p10)
}
  0x31   : > { %876 = dma.hbm_to_vmem [thread:$0]  (!%p1181_p0), %s193_s28, 128, %s196_s3, %s179_s7  }
  0x32   : > { %204 = sbr.rel (%p1199_p5) target bundleno = 144 (0x90), region = 28  ;;  %s1217_s25 = sand.u32 (!%p1199_p5), 1, %s1065_s10  }
  0x33   : > { %s850_s15 = sshll.u32 (!%p1199_p5), %s1217_s25, 5  ;;  %s207_s16 = scalar_lea.sflag (!%p1199_p5), [#allocation3], %s1217_s25 }
  0x34   : > { %s1221_s19 = scalar_lea.vmem (!%p1199_p5), [#allocation2], %s850_s15 }
  0x37   : > { %1048 = dma.done.wait (%p1154_p8), %s207_s16, 512  }
  0x38   : > { %1050 = vsyncadd (%p1154_p8), %s207_s16, 4294966784  ;;  %s851_s5 = sshll.u32 %s1217_s25, 3  ;;  %s216_s18 = scalar_lea.sflag [#allocation6], %s1217_s25 }
  0x39   : > { %s1229_s20 = scalar_lea.vmem [#allocation5], %s851_s5 }
  0x3a   : > { %1052 = dma.done.wait (%p1154_p8), %s216_s18, 128  }
  0x3b   : > { %1054 = vsyncadd (%p1154_p8), %s216_s18, 4294967168  ;;  %v255_v0 = vlaneseq  ;;  %v1085_v1 = vmov 839922192   ;;  %vm273_vm0 = vcmask 1043456   ;;  %v1238_v4 = vld [vmem:[%s1221_s19] sm:$0xff]  ;;  %v1241_v5 = vld [vmem:[%s1221_s19 + $0x8] sm:$0xff] }
  0x3c   : > { %v313_v2 = vunpack.c.l.s4 %v1085_v1  ;;  %v1086_v7 = vmov 1966171168   ;;  %v269_v9 = vcombine.high %v1238_v4, %v1238_v4  ;;  %v270_v10 = vcombine.high %v1241_v5, %v1241_v5  ;;  %v1252_v15 = vld [vmem:[%s1221_s19 + $0x10] sm:$0xff]  ;;  %v1257_v24 = vld [vmem:[%s1221_s19 + $0x18] sm:$0xff]  ;;  %s852_s21 = sshll.u32 %s1217_s25, 6  ;;  %s863_s28 = sshll.u32 %s1073_s12, 10 }
  0x3d   : > { %v1235_v3 = vshrl.u32 %v255_v0, 7  ;;  %v382_v8 = vunpack.c.l.s4 %v1086_v7  ;;  %v274_v11 = vsel %vm273_vm0, %v1238_v4, -inf  ;;  %v288_v12 = vsel %vm273_vm0, %v1241_v5, -inf  ;;  %s1332_s26 = scalar_lea.vmem [#allocation7], %s852_s21  ;;  %s1345_s3 = scalar_lea.hbm %s1399_s2, %s863_s28 }
  0x3e   : > { %v314_v6 = vunpack.c.0.s8 %v313_v2  ;;  %v275_v13 = vrot.slane %v274_v11, 4  ;;  %v289_v14 = vrot.slane %v288_v12, 4  ;;  %v281_v16 = vsel %vm273_vm0, %v269_v9, -inf  ;;  %s723_s27 = sshll.u32 %s1332_s26, 4  ;;  %s708_s7 = scalar_lea.sflag [#allocation4], %s1217_s25  ;;  %s1337_s27 = int_to_ptr.vmem [resolvable:$true] %s723_s27 }
  0x3f   : > { %v295_v17 = vsel %vm273_vm0, %v270_v10, -inf  ;;  %v1087_v18 = vmov 1   ;;  %v282_v21 = vrot.slane %v281_v16, 4  ;;  %v383_v26 = vunpack.c.0.s8 %v382_v8  ;;  %s997_s8 = scalar_lea.vmem %s1337_s27, 1024  ;;  %s1089_s30 = smov [#allocation7]  }
  0x40   : > { %v379_v19 = vcombine.low %v1087_v18, %v1087_v18  ;;  %v276_v20 = vmax.f32 %v274_v11, %v275_v13  ;;  %v290_v22 = vmax.f32 %v288_v12, %v289_v14  ;;  %v296_v23 = vrot.slane %v295_v17, 4  ;;  %p998_p8 = scmp.ne.s32.totalorder %s1337_s27, %s997_s8  ;;  %s1001_s4 = sshll.u32 %s1089_s30, 4  ;;  %s1002_s4 = int_to_ptr.vmem [resolvable:$false] %s1001_s4 }
  0x41   : > { %v317_v25 = vsub.s32 %v314_v6, %v1235_v3  ;;  %v472_v27 = vcombine.high %v1252_v15, %v1252_v15  ;;  %v476_v28 = vsel %vm273_vm0, %v1252_v15, -inf  ;;  %v283_v30 = vmax.f32 %v281_v16, %v282_v21  ;;  %s1003_s6 = scalar_lea.vmem %s1002_s4, 2048  ;;  %p1004_p13 = scmp.lt.s32.totalorder %s1337_s27, %s1002_s4 }
  0x42   : > { %v277_v29 = vrot.slane %v276_v20, 2  ;;  %v291_v31 = vrot.slane %v290_v22, 2  ;;  %v297_v32 = vmax.f32 %v295_v17, %v296_v23  ;;  %v473_v33 = vcombine.high %v1257_v24, %v1257_v24  ;;  %p999_p0 = pnand %p998_p8, %p1158_p9  ;;  %p1005_p5 = scmp.lt.s32.totalorder %s1003_s6, %s997_s8 }
  0x43   : > { %v477_v34 = vrot.slane %v476_v28, 4  ;;  %v483_v35 = vsel %vm273_vm0, %v472_v27, -inf  ;;  %v490_v36 = vsel %vm273_vm0, %v1257_v24, -inf  ;;  %v284_v38 = vrot.slane %v283_v30, 2 }
  0x44   : > { %v278_v37 = vmax.f32 %v276_v20, %v277_v29  ;;  %v292_v39 = vmax.f32 %v290_v22, %v291_v31  ;;  %v298_v40 = vrot.slane %v297_v32, 2  ;;  %v1270_v41 = vsub.s32 %v383_v26, %v1235_v3  ;;  %p1000_p3 = pneg %p999_p0  ;;  %p1006_p12 = por %p1005_p5, %p1004_p13 }
  0x45   : > { %v478_v42 = vmax.f32 %v476_v28, %v477_v34  ;;  %v484_v43 = vrot.slane %v483_v35, 4  ;;  %v491_v44 = vrot.slane %v490_v36, 4  ;;  %v285_v46 = vmax.f32 %v283_v30, %v284_v38 }
  0x46   : > { %v279_v45 = vrot.slane %v278_v37, 1  ;;  %v293_v47 = vrot.slane %v292_v39, 1  ;;  %v299_v48 = vmax.f32 %v297_v32, %v298_v40  ;;  %v497_v52 = vsel %vm273_vm0, %v473_v33, -inf  ;;  %p1007_p6 = pnand %p1006_p12, %p1000_p3 }
  0x47   : > { %v479_v49 = vrot.slane %v478_v42, 2  ;;  %v485_v50 = vmax.f32 %v483_v35, %v484_v43  ;;  %v492_v51 = vmax.f32 %v490_v36, %v491_v44  ;;  %v286_v54 = vrot.slane %v285_v46, 1 }
  0x48   : > { %v280_v53 = vmax.f32 %v278_v37, %v279_v45  ;;  %v294_v55 = vmax.f32 %v292_v39, %v293_v47  ;;  %v300_v56 = vrot.slane %v299_v48, 1  ;;  %v498_v60 = vrot.slane %v497_v52, 4 }
  0x49   : > { %v480_v57 = vmax.f32 %v478_v42, %v479_v49  ;;  %v486_v58 = vrot.slane %v485_v50, 2  ;;  %v493_v59 = vrot.slane %v492_v51, 2  ;;  %v287_v61 = vmax.f32 %v285_v46, %v286_v54  ;;  %v1291_v42 = vld [vmem:[%s1229_s20] sm:$0xf] }
  0x4a   : > { %v301_v62 = vmax.f32 %v299_v48, %v300_v56  ;;  %v1274_v63 = vrot.slane %v1235_v3, %v317_v25  ;;  %v387_v0 = vrot.slane %v379_v19, %v1270_v41  ;;  %v499_v7 = vmax.f32 %v497_v52, %v498_v60 }
  0x4b   : > { %v481_v1 = vrot.slane %v480_v57, 1  ;;  %v487_v2 = vmax.f32 %v485_v50, %v486_v58  ;;  %v494_v6 = vmax.f32 %v492_v51, %v493_v59  ;;  %v306_v8 = vcombine.low %v280_v53, %v287_v61 }
  0x4c   : > { %v307_v9 = vcombine.low %v294_v55, %v301_v62  ;;  %v500_v12 = vrot.slane %v499_v7, 2  ;;  %v395_v13 = vcombine.low %v387_v0, %v387_v0  ;;  %vm368_vm12 = vcmp.ge.s32.totalorder %v1291_v42, 0 }
  0x4d   : > { %v482_v10 = vmax.f32 %v480_v57, %v481_v1  ;;  %v488_v11 = vrot.slane %v487_v2, 1  ;;  %vm310_vm1 = vcmp.eq.f32.partialorder %v1238_v4, %v306_v8  ;;  %v495_v14 = vrot.slane %v494_v6, 1 }
  0x4e   : > { %vm311_vm2 = vcmp.eq.f32.partialorder %v1241_v5, %v307_v9  ;;  %v319_v16 = vsel %vm310_vm1, %v1274_v63, 4  ;;  %v501_v26 = vmax.f32 %v499_v7, %v500_v12  ;;  %v1286_v28 = vrot.slane %v395_v13, %v1270_v41 }
  0x4f   : > { %v320_v17 = vsel %vm311_vm2, %v1274_v63, 4  ;;  %v489_v18 = vmax.f32 %v487_v2, %v488_v11  ;;  %v321_v19 = vcombine.high %v319_v16, %v319_v16  ;;  %v323_v21 = vsel %vm273_vm0, %v319_v16, 2147483647 }
  0x50   : > { %v322_v20 = vcombine.high %v320_v17, %v320_v17  ;;  %v343_v22 = vsel %vm273_vm0, %v320_v17, 2147483647  ;;  %v324_v23 = vrot.slane %v323_v21, 4  ;;  %v496_v29 = vmax.f32 %v494_v6, %v495_v14 }
  0x51   : > { %v344_v25 = vrot.slane %v343_v22, 4  ;;  %v508_v27 = vcombine.low %v482_v10, %v489_v18  ;;  %v333_v4 = vsel %vm273_vm0, %v321_v19, 2147483647  ;;  %v502_v34 = vrot.slane %v501_v26, 1 }
  0x52   : > { %v353_v5 = vsel %vm273_vm0, %v322_v20, 2147483647  ;;  %vm325_vm3 = vcmp.lt.s32.totalorder %v323_v21, %v324_v23  ;;  %v334_v30 = vrot.slane %v333_v4, 4  ;;  %vm369_vm13 = vcmp.lt.s32.totalorder %v1291_v42, 4 }
  0x53   : > { %vm345_vm4 = vcmp.lt.s32.totalorder %v343_v22, %v344_v25  ;;  %v354_v31 = vrot.slane %v353_v5, 4  ;;  %v326_v32 = vsel %vm325_vm3, %v323_v21, %v324_v23  ;;  %vm512_vm5 = vcmp.eq.f32.partialorder %v1252_v15, %v508_v27 }
  0x54   : > { %v346_v33 = vsel %vm345_vm4, %v343_v22, %v344_v25  ;;  %v327_v35 = vrot.slane %v326_v32, 2  ;;  %vm335_vm6 = vcmp.lt.s32.totalorder %v333_v4, %v334_v30  ;;  %v503_v39 = vmax.f32 %v501_v26, %v502_v34 }
  0x55   : > { %v347_v36 = vrot.slane %v346_v33, 2  ;;  %vm355_vm7 = vcmp.lt.s32.totalorder %v353_v5, %v354_v31  ;;  %v336_v37 = vsel %vm335_vm6, %v333_v4, %v334_v30  ;;  %v514_v40 = vsel %vm512_vm5, %v1274_v63, 4 }
  0x56   : > { %v356_v38 = vsel %vm355_vm7, %v353_v5, %v354_v31  ;;  %vm328_vm8 = vcmp.lt.s32.totalorder %v326_v32, %v327_v35  ;;  %v337_v43 = vrot.slane %v336_v37, 2  ;;  %v509_v47 = vcombine.low %v496_v29, %v503_v39 }
  0x57   : > { %vm348_vm9 = vcmp.lt.s32.totalorder %v346_v33, %v347_v36  ;;  %v357_v44 = vrot.slane %v356_v38, 2  ;;  %v329_v45 = vsel %vm328_vm8, %v326_v32, %v327_v35  ;;  %v516_v48 = vcombine.high %v514_v40, %v514_v40 }
  0x58   : > { %v349_v46 = vsel %vm348_vm9, %v346_v33, %v347_v36  ;;  %v330_v15 = vrot.slane %v329_v45, 1  ;;  %vm338_vm10 = vcmp.lt.s32.totalorder %v336_v37, %v337_v43  ;;  %vm513_vm14 = vcmp.eq.f32.partialorder %v1257_v24, %v509_v47  ;;  %v855_v36 = vld [vmem:[%s1229_s20 + $0x4] sm:$0xf] }
  0x59   : > { %v350_v49 = vrot.slane %v349_v46, 1  ;;  %vm358_vm11 = vcmp.lt.s32.totalorder %v356_v38, %v357_v44  ;;  %v339_v50 = vsel %vm338_vm10, %v336_v37, %v337_v43  ;;  %v518_v52 = vsel %vm273_vm0, %v514_v40, 2147483647 }
  0x5a   : > { %v359_v51 = vsel %vm358_vm11, %v356_v38, %v357_v44  ;;  %vm331_vm15 = vcmp.lt.s32.totalorder %v329_v45, %v330_v15  ;;  %v340_v53 = vrot.slane %v339_v50, 1  ;;  %v515_v57 = vsel %vm513_vm14, %v1274_v63, 4 }
  0x5b   : > { %vm351_vm1 = vcmp.lt.s32.totalorder %v349_v46, %v350_v49  ;;  %v360_v54 = vrot.slane %v359_v51, 1  ;;  %v332_v55 = vsel %vm331_vm15, %v329_v45, %v330_v15  ;;  %v519_v58 = vrot.slane %v518_v52, 4 }
  0x5c   : > { %v352_v56 = vsel %vm351_vm1, %v349_v46, %v350_v49  ;;  %vm341_vm2 = vcmp.lt.s32.totalorder %v339_v50, %v340_v53  ;;  %v517_v59 = vcombine.high %v515_v57, %v515_v57  ;;  %v528_v60 = vsel %vm273_vm0, %v516_v48, 2147483647 }
  0x5d   : > { %vm361_vm3 = vcmp.lt.s32.totalorder %v359_v51, %v360_v54  ;;  %v342_v61 = vsel %vm341_vm2, %v339_v50, %v340_v53  ;;  %vm520_vm4 = vcmp.lt.s32.totalorder %v518_v52, %v519_v58  ;;  %v529_v24 = vrot.slane %v528_v60, 4 }
  0x5e   : > { %v362_v62 = vsel %vm361_vm3, %v359_v51, %v360_v54  ;;  %v406_v0 = vcombine.low %v332_v55, %v342_v61  ;;  %v521_v2 = vsel %vm520_vm4, %v518_v52, %v519_v58  ;;  %v538_v6 = vsel %vm273_vm0, %v515_v57, 2147483647 }
  0x5f   : > { %v407_v1 = vcombine.low %v352_v56, %v362_v62  ;;  %v522_v7 = vrot.slane %v521_v2, 2  ;;  %vm530_vm5 = vcmp.lt.s32.totalorder %v528_v60, %v529_v24  ;;  %v539_v8 = vrot.slane %v538_v6, 4 }
  0x60   : > { %v548_v63 = vsel %vm273_vm0, %v517_v59, 2147483647  ;;  %v414_v9 = vrot.slane %v406_v0, %v1270_v41  ;;  %v531_v11 = vsel %vm530_vm5, %v528_v60, %v529_v24  ;;  %v405_v13 = vmul.u32 4, %v1291_v42  ;;  %vm370_vm0 = vmand %vm368_vm12, %vm369_vm13 }
  0x61   : > { %v421_v10 = vrot.slane %v407_v1, %v1270_v41  ;;  %v549_v12 = vrot.slane %v548_v63, 4  ;;  %vm523_vm6 = vcmp.lt.s32.totalorder %v521_v2, %v522_v7  ;;  %v532_v14 = vrot.slane %v531_v11, 2 }
  0x62   : > { %vm540_vm7 = vcmp.lt.s32.totalorder %v538_v6, %v539_v8  ;;  %v524_v17 = vsel %vm523_vm6, %v521_v2, %v522_v7  ;;  %vm403_vm10 = vcmp.ne.s32.totalorder %v1286_v28, 0  ;;  %v434_v33 = vsub.s32 0, %v1235_v3 }
  0x63   : > { %v422_v16 = vcombine.low %v414_v9, %v421_v10  ;;  %v541_v18 = vsel %vm540_vm7, %v538_v6, %v539_v8  ;;  %vm550_vm8 = vcmp.lt.s32.totalorder %v548_v63, %v549_v12  ;;  %v525_v19 = vrot.slane %v524_v17, 1  ;;  %vm404_vm1 = vmand %vm370_vm0, %vm403_vm10 }
  0x64   : > { %vm533_vm9 = vcmp.lt.s32.totalorder %v531_v11, %v532_v14  ;;  %v542_v20 = vrot.slane %v541_v18, 2  ;;  %v551_v21 = vsel %vm550_vm8, %v548_v63, %v549_v12  ;;  %v438_v39 = vsub.s32 1, %v1235_v3 }
  0x65   : > { %v429_v22 = vrot.slane %v422_v16, %v1270_v41  ;;  %v534_v23 = vsel %vm533_vm9, %v531_v11, %v532_v14  ;;  %v552_v25 = vrot.slane %v551_v21, 2  ;;  %vm526_vm11 = vcmp.lt.s32.totalorder %v524_v17, %v525_v19 }
  0x66   : > { %v535_v26 = vrot.slane %v534_v23, 1  ;;  %vm543_vm14 = vcmp.lt.s32.totalorder %v541_v18, %v542_v20  ;;  %v527_v4 = vsel %vm526_vm11, %v524_v17, %v525_v19  ;;  %v442_v40 = vsub.s32 2, %v1235_v3 }
  0x67   : > { %v430_v27 = vadd.s32 %v429_v22, %v405_v13  ;;  %v544_v5 = vsel %vm543_vm14, %v541_v18, %v542_v20  ;;  %vm553_vm15 = vcmp.lt.s32.totalorder %v551_v21, %v552_v25  ;;  %v446_v42 = vsub.s32 3, %v1235_v3 }
  0x68   : > { %vm536_vm2 = vcmp.lt.s32.totalorder %v534_v23, %v535_v26  ;;  %v545_v29 = vrot.slane %v544_v5, 1  ;;  %v554_v30 = vsel %vm553_vm15, %v551_v21, %v552_v25  ;;  %vm563_vm3 = vcmp.ge.s32.totalorder %v855_v36, 0 }
  0x69   : > { %v537_v31 = vsel %vm536_vm2, %v534_v23, %v535_v26  ;;  %v555_v32 = vrot.slane %v554_v30, 1  ;;  %v431_v35 = vsel %vm404_vm1, %v430_v27, 4294967295  ;;  %vm564_vm4 = vcmp.lt.s32.totalorder %v855_v36, 4 }
  0x6a   : > { %vm546_vm12 = vcmp.lt.s32.totalorder %v544_v5, %v545_v29  ;;  %v601_v34 = vcombine.low %v527_v4, %v537_v31  ;;  %v435_v45 = vrot.slane %v431_v35, %v434_v33  ;;  %v439_v47 = vrot.slane %v431_v35, %v438_v39  ;;  %vm565_vm5 = vmand %vm563_vm3, %vm564_vm4 }
  0x6b   : > { %v547_v37 = vsel %vm546_vm12, %v544_v5, %v545_v29  ;;  %vm556_vm13 = vcmp.lt.s32.totalorder %v554_v30, %v555_v32  ;;  %v443_v48 = vrot.slane %v431_v35, %v442_v40  ;;  %v447_v15 = vrot.slane %v431_v35, %v446_v42  ;;  %vm599_vm7 = vmand %vm565_vm5, %vm403_vm10 }
  0x6c   : > { %v557_v38 = vsel %vm556_vm13, %v554_v30, %v555_v32  ;;  %v609_v44 = vrot.slane %v601_v34, %v1270_v41  ;;  %v600_v49 = vmul.u32 4, %v855_v36  ;;  %vm448_vm6 = vcmp.eq.s32.totalorder %v1235_v3, %v435_v45 }
  0x6d   : > { %v602_v43 = vcombine.low %v547_v37, %v557_v38  ;;  %v257_v51 = vadd.s32 8, %v1235_v3  ;;  %vm449_vm8 = vcmp.eq.s32.totalorder %v1235_v3, %v439_v47  ;;  %vm450_vm9 = vcmp.eq.s32.totalorder %v1235_v3, %v443_v48 }
  0x6e   : > { %vm451_vm0 = vcmp.eq.s32.totalorder %v1235_v3, %v447_v15  ;;  %v1088_v53 = vmov 0  }
  0x6f   : > { %v616_v46 = vrot.slane %v602_v43, %v1270_v41  ;;  %v456_v54 = vsel %vm448_vm6, 1, %v1088_v53  ;;  %vm452_vm11 = vcmp.eq.s32.totalorder %v257_v51, %v435_v45  ;;  %vm453_vm14 = vcmp.eq.s32.totalorder %v257_v51, %v439_v47 }
  0x70   : > { %vm454_vm15 = vcmp.eq.s32.totalorder %v257_v51, %v443_v48  ;;  %vm455_vm1 = vcmp.eq.s32.totalorder %v257_v51, %v447_v15  ;;  %v457_v57 = vsel %vm449_vm8, 1, %v1088_v53  ;;  %v459_v58 = vsel %vm451_vm0, 1, %v1088_v53 }
  0x71   : > { %v617_v50 = vcombine.low %v609_v44, %v616_v46  ;;  %v460_v62 = vsel %vm452_vm11, 1, %v1088_v53  ;;  %v461_v24 = vsel %vm453_vm14, 1, %v1088_v53  ;;  %v462_v0 = vsel %vm454_vm15, 1, %v1088_v53 }
  0x72   : > { %v463_v1 = vsel %vm455_vm1, 1, %v1088_v53 }
  0x73   : > { %v624_v52 = vrot.slane %v617_v50, %v1270_v41  ;;  %v458_v41 = vsel %vm450_vm9, 1, %v1088_v53 }
  0x75   : > { %v625_v55 = vadd.s32 %v624_v52, %v600_v49 }
  0x77   : > { %v626_v56 = vsel %vm599_vm7, %v625_v55, 4294967295 }
  0x78   : > { %v630_v28 = vrot.slane %v626_v56, %v434_v33  ;;  %v634_v59 = vrot.slane %v626_v56, %v438_v39  ;;  %v638_v60 = vrot.slane %v626_v56, %v442_v40  ;;  %v642_v61 = vrot.slane %v626_v56, %v446_v42 }
  0x7a   : > { %vm643_vm10 = vcmp.eq.s32.totalorder %v1235_v3, %v630_v28  ;;  %vm644_vm2 = vcmp.eq.s32.totalorder %v1235_v3, %v634_v59  ;;  %vm645_vm12 = vcmp.eq.s32.totalorder %v1235_v3, %v638_v60  ;;  %vm646_vm13 = vcmp.eq.s32.totalorder %v1235_v3, %v642_v61 }
  0x7b   : > { %v651_v2 = vsel %vm643_vm10, 1, %v1088_v53  ;;  %v652_v6 = vsel %vm644_vm2, 1, %v1088_v53  ;;  %v653_v7 = vsel %vm645_vm12, 1, %v1088_v53  ;;  %v654_v8 = vsel %vm646_vm13, 1, %v1088_v53 }
  0x7c   : > { %v659_v63 = vadd.s32 %v651_v2, %v456_v54  ;;  %v660_v9 = vadd.s32 %v652_v6, %v457_v57  ;;  %v661_v10 = vadd.s32 %v653_v7, %v458_v41  ;;  %v662_v11 = vadd.s32 %v654_v8, %v459_v58 }
  0x7d   : > { %vm647_vm3 = vcmp.eq.s32.totalorder %v257_v51, %v630_v28  ;;  %vm648_vm4 = vcmp.eq.s32.totalorder %v257_v51, %v634_v59  ;;  %vm649_vm5 = vcmp.eq.s32.totalorder %v257_v51, %v638_v60  ;;  %vm650_vm6 = vcmp.eq.s32.totalorder %v257_v51, %v642_v61 }
  0x7e   : > { %671 = vst [vmem:[%s1332_s26] sm:$0xff] %v659_v63  ;;  %672 = vst [vmem:[%s1332_s26 + $0x8] sm:$0xff] %v660_v9  ;;  %v655_v3 = vsel %vm647_vm3, 1, %v1088_v53  ;;  %v656_v12 = vsel %vm648_vm4, 1, %v1088_v53  ;;  %v657_v13 = vsel %vm649_vm5, 1, %v1088_v53  ;;  %v658_v14 = vsel %vm650_vm6, 1, %v1088_v53 }
  0x7f   : > { %673 = vst [vmem:[%s1332_s26 + $0x10] sm:$0xff] %v661_v10  ;;  %674 = vst [vmem:[%s1332_s26 + $0x18] sm:$0xff] %v662_v11  ;;  %v663_v16 = vadd.s32 %v655_v3, %v460_v62  ;;  %v664_v17 = vadd.s32 %v656_v12, %v461_v24  ;;  %v665_v18 = vadd.s32 %v657_v13, %v462_v0 }
  0x80   : > { %v666_v19 = vadd.s32 %v658_v14, %v463_v1 }
  0x81   : > { %675 = vst [vmem:[%s1332_s26 + $0x20] sm:$0xff] %v663_v16  ;;  %676 = vst [vmem:[%s1332_s26 + $0x28] sm:$0xff] %v664_v17 }
  0x82   : > { %677 = vst [vmem:[%s1332_s26 + $0x30] sm:$0xff] %v665_v18  ;;  %678 = vst [vmem:[%s1332_s26 + $0x38] sm:$0xff] %v666_v19 }
  0x83   : > { %1010 = shalt.err (!%p1007_p6)
}
  0x84   : > { %s1011_s15 = scalar_lea.hbm %s1345_s3, 1024  ;;  %s1015_s5 = scalar_lea.hbm %s1399_s2, 2048 }
  0x85   : > { %p1012_p7 = scmp.ne.s32.totalorder %s1345_s3, %s1011_s15  ;;  %p1016_p4 = scmp.lt.s32.totalorder %s1345_s3, %s1399_s2 }
  0x86   : > { %p1017_p10 = scmp.lt.s32.totalorder %s1015_s5, %s1011_s15 }
  0x87   : > { %p1013_p1 = pnand %p1012_p7, %p1158_p9 }
  0x88   : > { %p1018_p8 = por %p1017_p10, %p1016_p4 }
  0x89   : > { %p1014_p2 = pneg %p1013_p1 }
  0x8b   : > { %p1019_p0 = pnand %p1018_p8, %p1014_p2 }
  0x8d   : > { %1022 = shalt.err (!%p1019_p0)
}
  0x8e   : > { %s1090_s21 = smov 512   ;;  %s1091_s26 = smov 32  }
  0x8f   : > { %868 = dma.vmem_to_hbm [thread:$0]  (%p1158_p9), %s1337_s27, 1024, %s1345_s3, %s708_s7, %s1090_s21, %s1090_s21, %s1091_s26  }
  0x90 PF: > { %s738_s28 = sand.u32 1, %s1061_s9   ;;  %p1406_p3 = scmp.ge.s32.totalorder %s1081_s14, 2 }
  0x91   : > { %s739_s12 = scalar_lea.sflag [#allocation4], %s738_s28 }
  0x92   : > { %p878_p13 = pnand %p1406_p3, %p1165_p11 }
  0x94   : > { %p879_p5 = pneg %p878_p13 }
  0x96   : > { %1056 = dma.done.wait (%p879_p5), %s739_s12, 1024  }
  0x97   : > { %1058 = vsyncadd (%p879_p5), %s739_s12, 4294966272  ;;  %s21_s14 = sadd.s32 1, %s1081_s14   ;;  %s1407_s9 = smov %s1065_s10 }
  0x98   : > { %p18_p12 = scmp.ge.s32.totalorder %s21_s14, 4   ;;  %s1408_s10 = smov %s1069_s11 }
  0x99   : > { %s1409_s11 = smov %s1163_s23  ;;  %s1410_s12 = smov %s1077_s13 }
  0x9a   : > { %s1411_s13 = smov %s1413_s17  ;;  %20 = sbr.rel (!%p18_p12) target bundleno = 8 (0x8), region = 96 }
  0x9f   :  { %744 = vsyncpa [#allocation3], 1 }
  0xa0   :  { %746 = vsyncpa [#allocation3 + $0x1], 1 }
  0xa1   :  { %747 = vsyncpa [#allocation6], 1 }
  0xa2   :  { %749 = vsyncpa [#allocation6 + $0x1], 1 }
  0xa3   :  { %750 = vsyncpa [#allocation4], 1 }
  0xa4   :  { %752 = vsyncpa [#allocation4 + $0x1], 1 }

</bundles_post_ra>
